<compile_context>
chip_gen: v7x
topology: tpu7x:2x2x1
jax: 0.10.0
libtpu: 0.0.40
codegen_flags: <defaults>
</compile_context>

<pallas_src>
import jax
import jax.numpy as jnp
from jax.experimental import pallas as pl
from jax.experimental.pallas import tpu as pltpu


def _round_up(a: int, m: int) -> int:
    return (a + m - 1) // m * m


# ----------------------------------------------------------------------------
# Kernels
# ----------------------------------------------------------------------------

def _srelu_kernel(x_ref, wat_ref, o_ref):
    # x_ref:   (tm, Dp)  row tile of the input (K fully resident)
    # wat_ref: (Dp, tn)  column slab of the pre-transposed weight Wa.T
    # o_ref:   (tm, tn)  output tile
    t = jnp.dot(x_ref[...], wat_ref[...], preferred_element_type=jnp.float32)
    o_ref[...] = jnp.maximum(t, 0.0).astype(o_ref.dtype)


def _srelu_kernel_ktiled(x_ref, wat_ref, o_ref, acc_ref):
    # K-tiled variant: (tm, tk) x (tk, tn) with an f32 VMEM accumulator across
    # the (innermost, "arbitrary") k grid axis.  ReLU applied at finalize.
    k = pl.program_id(2)

    @pl.when(k == 0)
    def _():
        acc_ref[...] = jnp.zeros_like(acc_ref)

    acc_ref[...] += jnp.dot(x_ref[...], wat_ref[...],
                            preferred_element_type=jnp.float32)

    @pl.when(k == pl.num_programs(2) - 1)
    def _():
        o_ref[...] = jnp.maximum(acc_ref[...], 0.0).astype(o_ref.dtype)


# ----------------------------------------------------------------------------
# Tile / VMEM configuration
# ----------------------------------------------------------------------------

def _vmem_caps():
    """(tile-sizing budget, hard cap for vmem_limit_bytes), generation-aware."""
    try:
        cap = int(pltpu.get_tpu_info().vmem_capacity_bytes)
    except Exception:
        cap = 64 << 20  # conservative fallback: v7x per-TensorCore VMEM
    budget = min(cap * 3 // 4, 96 << 20)        # leave headroom for Mosaic
    limit_cap = min(cap * 9 // 10, 112 << 20)   # never request > physical
    return budget, limit_cap


def _tm_candidates(M: int, sub: int):
    """Row-tile candidates (largest first). Either multiples of the sublane
    packing `sub`, or exactly M (a full-extent block is always legal)."""
    cands = []
    if M <= 1024:
        cands.append(M)
    cands += [t for t in (1024, 512, 256, 128, 64, 32, 16, 8)
              if t % sub == 0 and t <= M]
    out, seen = [], set()
    for t in cands:
        if t > 0 and t not in seen:
            seen.add(t)
            out.append(t)
    return out or [max(M, 1)]


def _choose_config(M, Dp, x_isz, w_isz, o_isz, budget):
    sub = 16 if x_isz == 2 else 8
    tms = _tm_candidates(M, sub)
    tm_floor = min(256, tms[0])

    def vmem_full_k(tm, tn):
        # double-buffered x tile + weight slab + output tile
        return 2 * (tm * Dp * x_isz + Dp * tn * w_isz + tm * tn * o_isz)

    # 1) Whole Wa.T resident in VMEM -> weight read from HBM exactly once.
    for t in tms:
        if vmem_full_k(t, Dp) <= budget:
            if t >= tm_floor:
                return {"mode": "full_k", "tm": t, "tn": Dp, "tk": Dp}
            break

    # 2) K resident, weight streamed in (Dp, tn) lane-dense column slabs.
    #    Weight re-stream traffic ~ 1/tm, so prefer the largest fitting tm.
    tn = min(256, Dp)
    tm_stream = next((t for t in tms if vmem_full_k(t, tn) <= budget), None)

    # 3) K-tiled fallback (very large D and/or small VMEM, e.g. v7x): only
    #    worth it if it buys a strictly larger row tile than (2).
    best_ktiled = None
    for t in tms:
        for tk in (2048, 1024, 512, 256, 128):
            tk = min(tk, Dp)
            need = (2 * (t * tk * x_isz + tk * tn * w_isz + t * tn * o_isz)
                    + t * tn * 4)
            if need <= budget:
                best_ktiled = {"mode": "ktiled", "tm": t, "tn": tn, "tk": tk}
                break
        if best_ktiled is not None:
            break

    if tm_stream is not None and (best_ktiled is None
                                  or tm_stream >= best_ktiled["tm"]):
        return {"mode": "full_k", "tm": tm_stream, "tn": tn, "tk": Dp}
    if best_ktiled is not None:
        return best_ktiled
    # Last resort: tiny tiles, K-tiled.
    return {"mode": "ktiled", "tm": tms[-1], "tn": min(128, Dp),
            "tk": min(128, Dp)}


# ----------------------------------------------------------------------------
# Public API
# ----------------------------------------------------------------------------

def prepare_weight(wa: jnp.ndarray, *, use_bf16: bool = True) -> jnp.ndarray:
    """One-time transform of Wa (PyTorch layout, (D, D)) into the kernel's
    layout: Wa.T, cast to the MXU compute dtype, zero-padded so both dims are
    multiples of 128.  Hoisted out of the per-call path: do this once when the
    parameter is created/updated and reuse the result for every forward."""
    D = wa.shape[0]
    assert wa.shape == (D, D), "Wa must be square (D, D)"
    compute_dtype = jnp.bfloat16 if use_bf16 else wa.dtype
    Dp = _round_up(max(D, 1), 128)
    wa_t = wa.T.astype(compute_dtype)
    if Dp != D:
        wa_t = jnp.pad(wa_t, ((0, Dp - D), (0, Dp - D)))
    return wa_t


def srelu(x: jnp.ndarray, wa: jnp.ndarray = None, *, wa_t: jnp.ndarray = None,
          use_bf16: bool = True, tm: int = None) -> jnp.ndarray:
    """relu(x @ Wa.T) with a Pallas TPU kernel.

    x:    (..., D)
    wa:   (D, D) raw parameter (PyTorch layout); transformed inline if wa_t is
          not supplied.  For repeated calls pass wa_t=prepare_weight(wa).
    wa_t: pre-transformed weight from prepare_weight() (preferred).
    tm:   optional row-tile override (testing/tuning); must be a multiple of
          the sublane packing or equal to the flattened row count.
    """
    D = x.shape[-1]
    if wa_t is None:
        assert wa is not None, "pass either wa or wa_t"
        wa_t = prepare_weight(wa, use_bf16=use_bf16)
    Dp = wa_t.shape[0]
    assert wa_t.shape == (Dp, Dp) and Dp >= D and Dp % 128 == 0

    out_dtype = x.dtype
    compute_dtype = wa_t.dtype

    x2d = x.reshape(-1, D)
    M = x2d.shape[0]
    if M == 0:
        return jnp.zeros(x.shape, out_dtype)

    # Guarded pad/cast: no copy at all in the aligned, same-dtype case.
    if Dp != D:
        x2d = jnp.pad(x2d.astype(compute_dtype), ((0, 0), (0, Dp - D)))
    elif x2d.dtype != compute_dtype:
        x2d = x2d.astype(compute_dtype)

    x_isz = jnp.dtype(compute_dtype).itemsize
    w_isz = jnp.dtype(compute_dtype).itemsize
    o_isz = jnp.dtype(out_dtype).itemsize

    budget, limit_cap = _vmem_caps()
    cfg = _choose_config(M, Dp, x_isz, w_isz, o_isz, budget)
    if tm is not None:
        cfg = dict(cfg, tm=int(tm))
    tm_, tn_, tk_ = cfg["tm"], cfg["tn"], cfg["tk"]

    gm = pl.cdiv(M, tm_)
    gn = Dp // tn_

    if cfg["mode"] == "full_k":
        grid = (gm, gn)
        in_specs = [
            # x row tile: block index constant over j -> fetched once per row.
            pl.BlockSpec((tm_, Dp), lambda i, j: (i, 0)),
            # Wa.T column slab (the whole weight when tn == Dp -> read once).
            # TODO(synk): if slab DMA is still exposed, try
            # pipeline_mode=pl.Buffered(3) here (costs one extra Dp*tn buffer).
            pl.BlockSpec((Dp, tn_), lambda i, j: (0, j)),
        ]
        out_specs = pl.BlockSpec((tm_, tn_), lambda i, j: (i, j))
        scratch_shapes = []
        kernel = _srelu_kernel
        dim_sem = ("parallel", "parallel")   # M leading -> cores split rows
        weight_reads = 1 if tn_ == Dp else gm
        x_reads = 1
        vmem_need = 2 * (tm_ * Dp * x_isz + Dp * tn_ * w_isz
                         + tm_ * tn_ * o_isz)
    else:
        gk = Dp // tk_
        grid = (gm, gn, gk)
        in_specs = [
            pl.BlockSpec((tm_, tk_), lambda i, j, k: (i, k)),
            pl.BlockSpec((tk_, tn_), lambda i, j, k: (k, j)),
        ]
        out_specs = pl.BlockSpec((tm_, tn_), lambda i, j, k: (i, j))
        scratch_shapes = [pltpu.VMEM((tm_, tn_), jnp.float32)]
        kernel = _srelu_kernel_ktiled
        dim_sem = ("parallel", "parallel", "arbitrary")
        weight_reads = gm
        x_reads = gn
        vmem_need = (2 * (tm_ * tk_ * x_isz + tk_ * tn_ * w_isz
                          + tm_ * tn_ * o_isz) + tm_ * tn_ * 4)

    vmem_limit = int(min(max(vmem_need + (8 << 20), 32 << 20), limit_cap))

    cost = pl.CostEstimate(
        flops=2 * M * Dp * Dp,
        transcendentals=0,
        bytes_accessed=(x_reads * M * Dp * x_isz
                        + weight_reads * Dp * Dp * w_isz
                        + M * Dp * o_isz),
    )

    out = pl.pallas_call(
        kernel,
        out_shape=jax.ShapeDtypeStruct((M, Dp), out_dtype),
        grid_spec=pltpu.PrefetchScalarGridSpec(
            num_scalar_prefetch=0,
            grid=grid,
            in_specs=in_specs,
            out_specs=out_specs,
            scratch_shapes=scratch_shapes,
        ),
        compiler_params=pltpu.CompilerParams(
            dimension_semantics=dim_sem,
            vmem_limit_bytes=vmem_limit,
        ),
        cost_estimate=cost,
    )(x2d, wa_t)

    if Dp != D:
        out = out[:, :D]
    return out.reshape(x.shape)


# ----------------------------------------------------------------------------
# Demo / self-test
# ----------------------------------------------------------------------------

if __name__ == "__main__":
    key = jax.random.PRNGKey(0)

    # Small shapes consistent with the module: batch=2, seq=4, input_dim=32.
    batch, seq, input_dim = 2, 4, 32
    x = jax.random.normal(key, (batch, seq, input_dim), dtype=jnp.float32)

    # Module init: nn.Parameter(torch.eye(input_dim)).
    wa = jnp.eye(input_dim, dtype=jnp.float32)
    ref = jnp.maximum(x @ wa.T, 0.0)

    # Hoisted one-time weight prep + default bf16 MXU path.
    wa_t = prepare_weight(wa, use_bf16=True)
    out = srelu(x, wa_t=wa_t)
    jax.block_until_ready(out)
    assert out.shape == ref.shape
    assert jnp.allclose(out, ref, atol=1e-2, rtol=1e-2), "bf16 path mismatch"

    # Exact f32 path against the reference.
    out_f32 = srelu(x, wa, use_bf16=False)
    jax.block_until_ready(out_f32)
    assert jnp.allclose(out_f32, ref, atol=1e-5), "f32 path mismatch"

    # Ragged-M path (no M padding; masked final row tile) with a non-trivial
    # weight, f32 exact.
    wa2 = wa + 0.05 * jax.random.normal(jax.random.PRNGKey(1),
                                        (input_dim, input_dim), jnp.float32)
    x2 = jax.random.normal(jax.random.PRNGKey(2), (2, 5, input_dim),
                           dtype=jnp.float32)
    ref2 = jnp.maximum(x2 @ wa2.T, 0.0)
    out2 = srelu(x2, wa2, use_bf16=False, tm=8)   # M=10 -> grid of 2 row tiles
    jax.block_until_ready(out2)
    assert jnp.allclose(out2, ref2, atol=1e-5), "ragged-M path mismatch"

    print("KERNEL_OK")
</pallas_src>

<mosaic_0001>
module attributes {stable_mosaic.version = 11 : i64} {
  func.func @_srelu_kernel(%arg0: i32, %arg1: i32, %arg2: memref<8x128xbf16, #tpu.memory_space<vmem>>, %arg3: memref<128x128xbf16, #tpu.memory_space<vmem>>, %arg4: memref<8x128xf32, #tpu.memory_space<vmem>>) attributes {dimension_semantics = [#tpu.dimension_semantics<parallel>, #tpu.dimension_semantics<parallel>], iteration_bounds = array<i64: 1, 1>, scalar_prefetch = 0 : i64, scratch_operands = 0 : i64, tpu.core_type = #tpu.core_type<tc>, window_params = [{transform_indices = @transform_0, window_bounds = array<i64: 8, 128>}, {transform_indices = @transform_1, window_bounds = array<i64: 128, 128>}, {transform_indices = @transform_2, window_bounds = array<i64: 8, 128>}]} {
    %c0 = arith.constant 0 : index
    %c0_0 = arith.constant 0 : index
    %0 = vector.load %arg2[%c0, %c0_0] : memref<8x128xbf16, #tpu.memory_space<vmem>>, vector<8x128xbf16>
    %c0_1 = arith.constant 0 : index
    %c0_2 = arith.constant 0 : index
    %1 = vector.load %arg3[%c0_1, %c0_2] : memref<128x128xbf16, #tpu.memory_space<vmem>>, vector<128x128xbf16>
    %cst = arith.constant dense<0.000000e+00> : vector<8x128xf32>
    %2 = tpu.matmul %0, %1, %cst {dimension_numbers = #tpu.dot_dimension_numbers<[1], [0], [0], [1], [0, 0, 1, 1], [], []>} : vector<8x128xbf16>, vector<128x128xbf16>, vector<8x128xf32> -> vector<8x128xf32>
    %cst_3 = arith.constant 0.000000e+00 : f32
    %3 = vector.broadcast %cst_3 : f32 to vector<8x128xf32>
    %4 = arith.maximumf %2, %3 : vector<8x128xf32>
    %c0_4 = arith.constant 0 : index
    %c0_5 = arith.constant 0 : index
    %5 = vector.load %arg4[%c0_4, %c0_5] : memref<8x128xf32, #tpu.memory_space<vmem>>, vector<8x128xf32>
    tpu.vector_store %arg4[%c0_4, %c0_5], %4 {strides = array<i32>} : memref<8x128xf32, #tpu.memory_space<vmem>>, vector<8x128xf32>,
    return
  }
  func.func @transform_0(%arg0: i32, %arg1: i32) -> (i32, i32) {
    %c0_i32 = arith.constant 0 : i32
    %c0_i32_0 = arith.constant 0 : i32
    return %arg0, %c0_i32 : i32, i32
  }
  func.func @transform_1(%arg0: i32, %arg1: i32) -> (i32, i32) {
    %c0_i32 = arith.constant 0 : i32
    %c0_i32_0 = arith.constant 0 : i32
    return %c0_i32, %arg1 : i32, i32
  }
  func.func @transform_2(%arg0: i32, %arg1: i32) -> (i32, i32) {
    %c0_i32 = arith.constant 0 : i32
    return %arg0, %arg1 : i32, i32
  }
}

</mosaic_0001>

<bundles_post_ra>
// kernel: tpu_custom_call.1
= control target key start
LH: loop header
LB: loop body
LE: loop exit
PB: predicated region body
PF: predicated region fallthrough
CT: control target
= control target key end

     0   :  { %7 = vsyncpa [#allocation3], 0  ;;  %s351_s0 = inlined_call_operand.hbm [shape: bf16[8,128], index: 0, kind: input, shape index: {}]   ;;  %s352_s1 = inlined_call_operand.hbm [shape: bf16[128,128], index: 1, kind: input, shape index: {}]   ;;  %s353_s2 = inlined_call_operand.hbm [shape: f32[8,128], index: 2, kind: output, shape index: {}]  }
   0x1   :  { %8 = vsyncpa [#allocation6], 0 }
   0x2   :  { %9 = vsyncpa [#allocation4], 0  ;;  %s286_s9 = smov [#allocation2]   ;;  %s287_s11 = smov [#allocation5]  }
   0x3   :  { %s16_s10 = sshll.u32 %s286_s9, 4  ;;  %s25_s12 = sshll.u32 %s287_s11, 4  ;;  %s17_s10 = int_to_ptr.vmem [resolvable:$true] %s16_s10  ;;  %s308_s12 = int_to_ptr.vmem [resolvable:$true] %s25_s12 }
   0x4   :  { %s214_s15 = scalar_lea.hbm %s351_s0, 64 }
   0x5   :  { %p215_p0 = scmp.ne.s32.totalorder %s351_s0, %s214_s15  ;;  %p218_p1 = scmp.lt.u32.totalorder %s214_s15, %s351_s0 }
   0x7   :  { %p220_p2 = pnand %p218_p1, %p215_p0 }
   0x9   :  { %223 = shalt.err (!%p220_p2)
}
   0xa   :  { %s224_s20 = scalar_lea.vmem %s17_s10, 64  ;;  %p229_p4 = scmp.lt.s32.totalorder %s17_s10, %s17_s10 }
   0xb   :  { %p225_p3 = scmp.ne.s32.totalorder %s17_s10, %s224_s20  ;;  %p230_p5 = scmp.lt.s32.totalorder %s224_s20, %s224_s20 }
   0xd   :  { %p231_p6 = por %p230_p5, %p229_p4 }
   0xf   :  { %p232_p7 = pnand %p231_p6, %p225_p3 }
  0x11   :  { %235 = shalt.err (!%p232_p7)
}
  0x12   :  { %19 = dma.hbm_to_vmem [thread:$0]  %s351_s0, 64, %s17_s10, [#allocation3]  }
  0x13   :  { %s236_s25 = scalar_lea.hbm %s352_s1, 1024 }
  0x14   :  { %p237_p8 = scmp.ne.s32.totalorder %s352_s1, %s236_s25  ;;  %p240_p9 = scmp.lt.u32.totalorder %s236_s25, %s352_s1 }
  0x16   :  { %p242_p10 = pnand %p240_p9, %p237_p8 }
  0x18   :  { %245 = shalt.err (!%p242_p10)
}
  0x19   :  { %s246_s30 = scalar_lea.vmem %s308_s12, 1024  ;;  %p251_p12 = scmp.lt.s32.totalorder %s308_s12, %s308_s12 }
  0x1a   :  { %p247_p11 = scmp.ne.s32.totalorder %s308_s12, %s246_s30  ;;  %p252_p13 = scmp.lt.s32.totalorder %s246_s30, %s246_s30 }
  0x1c   :  { %p253_p0 = por %p252_p13, %p251_p12 }
  0x1e   :  { %p254_p1 = pnand %p253_p0, %p247_p11 }
  0x20   :  { %257 = shalt.err (!%p254_p1)
}
  0x21   :  { %s288_s0 = smov 64   ;;  %s289_s3 = smov 4  }
  0x22   :  { %31 = dma.hbm_to_vmem [thread:$0]  %s352_s1, 1024, %s308_s12, [#allocation6], %s288_s0, %s288_s0, %s289_s3  }
  0x23   :  { %280 = dma.done.wait [#allocation3], 64  }
  0x24   :  { %281 = vsyncadd [#allocation3], 4294967232 }
  0x25   :  { %282 = dma.done.wait [#allocation6], 1024  }
  0x26   :  { %283 = vsyncadd [#allocation6], 4294966272  ;;  %v290_v0 = vmov 0.0   ;;  %vm291_vm0 = vmmov 0   ;;  %v206_v1 = vld [vmem:[#allocation5] sm:$0xff]   ;;  %v207_v2 = vld [vmem:[#allocation5 + $0x8] sm:$0xff]  }
  0x27   :  { %179 = vmatprep.subr.bf16.mxu0 %v290_v0  ;;  %195 = vmatprep.mubr.msk.bf16.mxu0 %vm291_vm0, %v290_v0  ;;  %v208_v3 = vld [vmem:[#allocation5 + $0x10] sm:$0xff]   ;;  %v209_v4 = vld [vmem:[#allocation5 + $0x18] sm:$0xff]   ;;  %v210_v5 = vld [vmem:[#allocation5 + $0x20] sm:$0xff]   ;;  %s292_s1 = smov [#allocation7]  }
  0x28   :  { %180 = vmatpush3.bf16.msra.mxu0 %v206_v1  ;;  %v211_v6 = vld [vmem:[#allocation5 + $0x28] sm:$0xff]   ;;  %v212_v7 = vld [vmem:[#allocation5 + $0x30] sm:$0xff]   ;;  %v213_v8 = vld [vmem:[#allocation5 + $0x38] sm:$0xff]   ;;  %s152_s6 = sshll.u32 %s292_s1, 4  ;;  %s153_s6 = int_to_ptr.vmem [resolvable:$true] %s152_s6 }
  0x29   :  { %181 = vmatprep.subr.bf16.mxu0 %v290_v0  ;;  %v39_v9 = vld [vmem:[#allocation2] sm:$0xf]  ;;  %s258_s7 = scalar_lea.vmem %s153_s6, 128  ;;  %p263_p3 = scmp.lt.s32.totalorder %s153_s6, %s153_s6 }
  0x2a   :  { %p259_p2 = scmp.ne.s32.totalorder %s153_s6, %s258_s7  ;;  %p264_p4 = scmp.lt.s32.totalorder %s258_s7, %s258_s7 }
  0x2c   :  { %182 = vmatpush3.bf16.msra.mxu0 %v207_v2  ;;  %p265_p5 = por %p264_p4, %p263_p3 }
  0x2d   :  { %183 = vmatprep.subr.bf16.mxu0 %v290_v0 }
  0x2e   :  { %p266_p6 = pnand %p265_p5, %p259_p2 }
  0x30   :  { %184 = vmatpush3.bf16.msra.mxu0 %v208_v3 }
  0x31   :  { %185 = vmatprep.subr.bf16.mxu0 %v290_v0 }
  0x34   :  { %186 = vmatpush3.bf16.msra.mxu0 %v209_v4 }
  0x35   :  { %187 = vmatprep.subr.bf16.mxu0 %v290_v0 }
  0x38   :  { %188 = vmatpush3.bf16.msra.mxu0 %v210_v5 }
  0x39   :  { %189 = vmatprep.subr.bf16.mxu0 %v290_v0 }
  0x3c   :  { %190 = vmatpush3.bf16.msra.mxu0 %v211_v6 }
  0x3d   :  { %191 = vmatprep.subr.bf16.mxu0 %v290_v0 }
  0x40   :  { %192 = vmatpush3.bf16.msra.mxu0 %v212_v7 }
  0x41   :  { %193 = vmatprep.subr.bf16.mxu0 %v290_v0 }
  0x44   :  { %194 = vmatpush3.bf16.msra.mxu0 %v213_v8 }
  0x47   :  { %196 = vmatmul.mubr.bf16.vlgmr.msra.gmra.mrb[0].mxu0 %v39_v9 }
 0x11a   :  { %v138_v10 = vpop.f32.mrb[0].mxu0 }
 0x11b   :  { %v144_v11 = vmax.f32 %v138_v10, 0.0  ;;  %v197_v12 = vpop.f32.mrb[1].mxu0 }
 0x11c   :  { %v141_v13 = vpop.f32.mrb[2].mxu0 }
 0x11d   :  { %145 = vst [vmem:[#allocation7] sm:$0xff] %v144_v11  ;;  %v198_v14 = vpop.f32.mrb[3].mxu0 }
 0x11e   :  { %269 = shalt.err (!%p266_p6)
}
 0x11f   :  { %s270_s10 = scalar_lea.hbm %s353_s2, 128 }
 0x120   :  { %p271_p7 = scmp.ne.s32.totalorder %s353_s2, %s270_s10  ;;  %p274_p8 = scmp.lt.u32.totalorder %s270_s10, %s353_s2 }
 0x122   :  { %p276_p9 = pnand %p274_p8, %p271_p7 }
 0x124   :  { %279 = shalt.err (!%p276_p9)
}
 0x125   :  { %155 = dma.vmem_to_hbm [thread:$0]  %s153_s6, 128, %s353_s2, [#allocation4]  }
 0x126   :  { %284 = dma.done.wait [#allocation4], 128  }
 0x127   :  { %285 = vsyncadd [#allocation4], 4294967168 }
 0x128   :  { %159 = vsyncpa [#allocation3], 1 }
 0x129   :  { %160 = vsyncpa [#allocation6], 1 }
 0x12a   :  { %161 = vsyncpa [#allocation4], 1 }

</bundles_post_ra>
